<compile_context>
chip_gen: v6e
topology: v6e:2x2x1
jax: 0.10.0
libtpu: 0.0.40
codegen_flags: <defaults>
</compile_context>

<pallas_src>
import jax
import jax.numpy as jnp
from jax.experimental import pallas as pl
from jax.experimental.pallas import tpu as pltpu


# ----------------------------- kernels --------------------------------------


def adaptmlp_kernel(x_ref, wd_ref, bd_ref, wu_ref, bu_ref, o_ref):
    # x_ref:  (tm, Dp)        compute dtype
    # wd_ref: (Dp, H)         compute dtype    bd_ref: (1, H)  f32
    # wu_ref: (H, Dp)         compute dtype    bu_ref: (1, Dp) f32
    x = x_ref[...]
    down = jnp.dot(x, wd_ref[...], preferred_element_type=jnp.float32) + bd_ref[...]
    relu = jnp.maximum(down, 0.0).astype(wu_ref.dtype)
    up = jnp.dot(relu, wu_ref[...], preferred_element_type=jnp.float32) + bu_ref[...]
    o_ref[...] = up.astype(o_ref.dtype)


def adaptmlp_residual_kernel(x_ref, res_ref, wd_ref, bd_ref, wu_ref, bu_ref, o_ref):
    # Same as above but fuses `out = residual + adapter(x)` into the epilogue.
    x = x_ref[...]
    down = jnp.dot(x, wd_ref[...], preferred_element_type=jnp.float32) + bd_ref[...]
    relu = jnp.maximum(down, 0.0).astype(wu_ref.dtype)
    up = jnp.dot(relu, wu_ref[...], preferred_element_type=jnp.float32) + bu_ref[...]
    up = up + res_ref[...].astype(jnp.float32)
    o_ref[...] = up.astype(o_ref.dtype)


# ----------------------------- helpers --------------------------------------


def _round_up(x, m):
    return (x + m - 1) // m * m


def _pad_axis(a, axis, target):
    pad = target - a.shape[axis]
    if pad == 0:
        return a
    cfg = [(0, 0)] * a.ndim
    cfg[axis] = (0, pad)
    return jnp.pad(a, cfg)


def _vmem_capacity_bytes():
    """Per-core VMEM capacity; conservative fallback if the query is unavailable."""
    try:
        info = pltpu.get_tpu_info()
        cap = getattr(info, "vmem_capacity_bytes", None)
        if cap:
            return int(cap)
    except Exception:
        pass
    return 64 * 1024 * 1024  # v7x per-TensorCore VMEM (safe lower bound across chips)


def _choose_row_tile(n_rows_aligned, d_pad, hidden, x_bytes, out_bytes,
                     has_residual, vmem_budget):
    # Resident weights (counted double-buffered to be conservative) + double-buffered
    # row streams (x tile, optional residual tile, out tile).
    weight_bytes = 2 * (2 * d_pad * hidden * x_bytes + (hidden + d_pad) * 4)
    per_row = 2 * d_pad * (x_bytes + out_bytes + (x_bytes if has_residual else 0))
    avail = max(vmem_budget - weight_bytes, 8 * per_row)
    tm = int(max(8, min(avail // per_row, 1024, n_rows_aligned)))
    tm = max(8, (tm // 8) * 8)
    # v7x has 2 TensorCores: prefer >= 2 grid steps when there are enough rows.
    if n_rows_aligned // tm < 2 and n_rows_aligned >= 16:
        tm = max(8, _round_up(n_rows_aligned // 2, 8) // 8 * 8)
        tm = max(8, min(tm, _round_up(n_rows_aligned // 2, 8)))
    return tm


# ----------------------------- wrapper --------------------------------------


def adapt_mlp(x2d, w_down, b_down, w_up, b_up, residual=None, *,
              tm=None, compute_dtype=None):
    """AdaptMLP forward: relu(x @ W_down + b_down) @ W_up + b_up  [+ residual].

    x2d:      (N, D)          weights in [in, out] layout:
    w_down:   (D, H)          b_down: (H,)
    w_up:     (H, D)          b_up:   (D,)
    residual: optional (N, D) tensor fused into the epilogue (out = residual + adapter(x)).
    compute_dtype: dtype for the x/residual/weight streams (e.g. jnp.bfloat16);
                   biases, accumulation and the epilogue stay in f32.
    """
    N, D = x2d.shape
    Din, H = w_down.shape
    assert Din == D and w_up.shape == (H, D)
    assert b_down.shape == (H,) and b_up.shape == (D,)
    if residual is not None:
        assert residual.shape == (N, D)

    cdt = jnp.dtype(compute_dtype) if compute_dtype is not None else jnp.dtype(x2d.dtype)
    out_dtype = cdt
    x_bytes = cdt.itemsize
    o_bytes = jnp.dtype(out_dtype).itemsize

    # Lane-dense feature dim (avoids masked partial stores for D not multiple of 128).
    Dp = _round_up(D, 128)

    # Row tile sized against the real VMEM budget of this chip generation.
    vmem_cap = _vmem_capacity_bytes()
    n_aligned = _round_up(N, 8)
    if tm is None:
        tm = _choose_row_tile(n_aligned, Dp, H, x_bytes, o_bytes,
                              residual is not None, vmem_cap // 2)
    else:
        assert tm % 8 == 0 and tm > 0
    Np = _round_up(N, tm)

    # Cast + pad operands (zero padding is exact: padded lanes contribute +0.0).
    xk = _pad_axis(_pad_axis(x2d.astype(cdt), 1, Dp), 0, Np)                 # (Np, Dp)
    wdk = _pad_axis(w_down.astype(cdt), 0, Dp)                               # (Dp, H)
    wuk = _pad_axis(w_up.astype(cdt), 1, Dp)                                 # (H, Dp)
    bdk = b_down.astype(jnp.float32).reshape(1, H)                           # (1, H)
    buk = _pad_axis(b_up.astype(jnp.float32).reshape(1, D), 1, Dp)           # (1, Dp)
    resk = None
    if residual is not None:
        resk = _pad_axis(_pad_axis(residual.astype(cdt), 1, Dp), 0, Np)      # (Np, Dp)

    grid = (Np // tm,)

    # Advisory cost estimate (mem-bound kernel: flops ~ 4*N*D*H, bytes ~ streams + weights).
    stream_bytes = Np * Dp * (x_bytes + o_bytes + (x_bytes if residual is not None else 0))
    weight_bytes = 2 * Dp * H * x_bytes + (H + Dp) * 4
    cost = pl.CostEstimate(flops=4 * Np * Dp * H, transcendentals=0,
                           bytes_accessed=int(stream_bytes + weight_bytes))

    # Explicit scoped-VMEM limit derived from the tiles (not the default 16/32 MiB).
    needed = (2 * weight_bytes
              + 2 * tm * Dp * (x_bytes + o_bytes
                               + (x_bytes if residual is not None else 0)))
    vmem_limit = int(min(vmem_cap, max(2 * needed, 32 * 1024 * 1024)))

    row_spec = pl.BlockSpec((tm, Dp), lambda i: (i, 0))
    wd_spec = pl.BlockSpec((Dp, H), lambda i: (0, 0))     # resident across the row grid
    bd_spec = pl.BlockSpec((1, H), lambda i: (0, 0))
    wu_spec = pl.BlockSpec((H, Dp), lambda i: (0, 0))     # resident across the row grid
    bu_spec = pl.BlockSpec((1, Dp), lambda i: (0, 0))

    if residual is None:
        kernel = adaptmlp_kernel
        in_specs = [row_spec, wd_spec, bd_spec, wu_spec, bu_spec]
        args = (xk, wdk, bdk, wuk, buk)
    else:
        kernel = adaptmlp_residual_kernel
        in_specs = [row_spec, row_spec, wd_spec, bd_spec, wu_spec, bu_spec]
        args = (xk, resk, wdk, bdk, wuk, buk)

    out = pl.pallas_call(
        kernel,
        out_shape=jax.ShapeDtypeStruct((Np, Dp), out_dtype),
        grid_spec=pltpu.PrefetchScalarGridSpec(
            num_scalar_prefetch=0,
            grid=grid,
            in_specs=in_specs,
            out_specs=pl.BlockSpec((tm, Dp), lambda i: (i, 0)),
        ),
        compiler_params=pltpu.CompilerParams(
            dimension_semantics=("parallel",),
            vmem_limit_bytes=vmem_limit,
        ),
        cost_estimate=cost,
    )(*args)

    return out[:N, :D]


def adapt_mlp_ref(x2d, w_down, b_down, w_up, b_up):
    down = x2d @ w_down + b_down
    relu = jnp.maximum(down, 0.0)
    return relu @ w_up + b_up


# ----------------------------- demo / check ---------------------------------


if __name__ == "__main__":
    # Small shapes consistent with the module: batch=2, seq=8, input_dim=32, hidden_dim=8
    batch, seq, input_dim, hidden_dim = 2, 8, 32, 8

    key = jax.random.PRNGKey(0)
    kx, kwd, kbd, kwu, kbu, kres = jax.random.split(key, 6)

    x = jax.random.normal(kx, (batch, seq, input_dim), dtype=jnp.float32)

    # Deterministic parameter init (mimicking nn.Linear's uniform fan-in init),
    # stored as [in, out] (transpose of PyTorch's [out, in]).
    bound_d = 1.0 / (input_dim ** 0.5)
    w_down = jax.random.uniform(kwd, (input_dim, hidden_dim), jnp.float32,
                                -bound_d, bound_d)
    b_down = jax.random.uniform(kbd, (hidden_dim,), jnp.float32, -bound_d, bound_d)

    bound_u = 1.0 / (hidden_dim ** 0.5)
    w_up = jax.random.uniform(kwu, (hidden_dim, input_dim), jnp.float32,
                              -bound_u, bound_u)
    b_up = jax.random.uniform(kbu, (input_dim,), jnp.float32, -bound_u, bound_u)

    # Linear applies to the last axis only -> flatten leading dims.
    x2d = x.reshape(-1, input_dim)
    ref2d = adapt_mlp_ref(x2d, w_down, b_down, w_up, b_up)

    # 1) f32 path (module-faithful): tight check.
    out_f32 = adapt_mlp(x2d, w_down, b_down, w_up, b_up)
    jax.block_until_ready(out_f32)
    assert out_f32.shape == (batch * seq, input_dim)
    assert jnp.allclose(out_f32, ref2d, atol=2e-5, rtol=2e-5), "f32 path mismatch"

    # 2) bf16 streams + f32 accumulation (bandwidth-optimized path): loose check.
    out_bf16 = adapt_mlp(x2d, w_down, b_down, w_up, b_up,
                         compute_dtype=jnp.bfloat16)
    jax.block_until_ready(out_bf16)
    assert jnp.allclose(out_bf16.astype(jnp.float32), ref2d,
                        atol=5e-2, rtol=5e-2), "bf16 path mismatch"

    # 3) fused residual epilogue (how the Adapter consumes the AdaptMLP output).
    res2d = jax.random.normal(kres, (batch * seq, input_dim), dtype=jnp.float32)
    out_res = adapt_mlp(x2d, w_down, b_down, w_up, b_up, residual=res2d)
    jax.block_until_ready(out_res)
    assert jnp.allclose(out_res, ref2d + res2d, atol=2e-5, rtol=2e-5), \
        "fused residual path mismatch"

    out = out_f32.reshape(batch, seq, input_dim)
    jax.block_until_ready(out)

    print("KERNEL_OK")
</pallas_src>

<mosaic_0001>
module attributes {stable_mosaic.version = 11 : i64} {
  func.func @adaptmlp_kernel(%arg0: i32, %arg1: memref<8x128xf32, #tpu.memory_space<vmem>>, %arg2: memref<128x8xf32, #tpu.memory_space<vmem>>, %arg3: memref<1x8xf32, #tpu.memory_space<vmem>>, %arg4: memref<8x128xf32, #tpu.memory_space<vmem>>, %arg5: memref<1x128xf32, #tpu.memory_space<vmem>>, %arg6: memref<8x128xf32, #tpu.memory_space<vmem>>) attributes {dimension_semantics = [#tpu.dimension_semantics<parallel>], iteration_bounds = array<i64: 2>, scalar_prefetch = 0 : i64, scratch_operands = 0 : i64, tpu.core_type = #tpu.core_type<tc>, window_params = [{transform_indices = @transform_0, window_bounds = array<i64: 8, 128>}, {pipeline_mode = #tpu.pipeline_mode<synchronous>, transform_indices = @transform_1, window_bounds = array<i64: 128, 8>}, {pipeline_mode = #tpu.pipeline_mode<synchronous>, transform_indices = @transform_2, window_bounds = array<i64: 1, 8>}, {pipeline_mode = #tpu.pipeline_mode<synchronous>, transform_indices = @transform_3, window_bounds = array<i64: 8, 128>}, {pipeline_mode = #tpu.pipeline_mode<synchronous>, transform_indices = @transform_4, window_bounds = array<i64: 1, 128>}, {transform_indices = @transform_5, window_bounds = array<i64: 8, 128>}]} {
    %c0 = arith.constant 0 : index
    %c0_0 = arith.constant 0 : index
    %0 = vector.load %arg1[%c0, %c0_0] : memref<8x128xf32, #tpu.memory_space<vmem>>, vector<8x128xf32>
    %c0_1 = arith.constant 0 : index
    %c0_2 = arith.constant 0 : index
    %1 = vector.load %arg2[%c0_1, %c0_2] : memref<128x8xf32, #tpu.memory_space<vmem>>, vector<128x8xf32>
    %cst = arith.constant dense<0.000000e+00> : vector<8x8xf32>
    %2 = tpu.matmul %0, %1, %cst {dimension_numbers = #tpu.dot_dimension_numbers<[1], [0], [0], [1], [0, 0, 1, 1], [], []>} : vector<8x128xf32>, vector<128x8xf32>, vector<8x8xf32> -> vector<8x8xf32>
    %c0_3 = arith.constant 0 : index
    %c0_4 = arith.constant 0 : index
    %3 = vector.load %arg3[%c0_3, %c0_4] : memref<1x8xf32, #tpu.memory_space<vmem>>, vector<1x8xf32>
    %4 = vector.broadcast %3 : vector<1x8xf32> to vector<8x8xf32>
    %5 = arith.addf %2, %4 : vector<8x8xf32>
    %cst_5 = arith.constant 0.000000e+00 : f32
    %6 = vector.broadcast %cst_5 : f32 to vector<8x8xf32>
    %7 = arith.maximumf %5, %6 : vector<8x8xf32>
    %c0_6 = arith.constant 0 : index
    %c0_7 = arith.constant 0 : index
    %8 = vector.load %arg4[%c0_6, %c0_7] : memref<8x128xf32, #tpu.memory_space<vmem>>, vector<8x128xf32>
    %cst_8 = arith.constant dense<0.000000e+00> : vector<8x128xf32>
    %9 = tpu.matmul %7, %8, %cst_8 {dimension_numbers = #tpu.dot_dimension_numbers<[1], [0], [0], [1], [0, 0, 1, 1], [], []>} : vector<8x8xf32>, vector<8x128xf32>, vector<8x128xf32> -> vector<8x128xf32>
    %c0_9 = arith.constant 0 : index
    %c0_10 = arith.constant 0 : index
    %10 = vector.load %arg5[%c0_9, %c0_10] : memref<1x128xf32, #tpu.memory_space<vmem>>, vector<1x128xf32>
    %11 = vector.broadcast %10 : vector<1x128xf32> to vector<8x128xf32>
    %12 = arith.addf %9, %11 : vector<8x128xf32>
    %c0_11 = arith.constant 0 : index
    %c0_12 = arith.constant 0 : index
    %13 = vector.load %arg6[%c0_11, %c0_12] : memref<8x128xf32, #tpu.memory_space<vmem>>, vector<8x128xf32>
    tpu.vector_store %arg6[%c0_11, %c0_12], %12 {strides = array<i32>} : memref<8x128xf32, #tpu.memory_space<vmem>>, vector<8x128xf32>,
    return
  }
  func.func @transform_0(%arg0: i32) -> (i32, i32) {
    %c0_i32 = arith.constant 0 : i32
    %c0_i32_0 = arith.constant 0 : i32
    return %arg0, %c0_i32 : i32, i32
  }
  func.func @transform_1(%arg0: i32) -> (i32, i32) {
    %c0_i32 = arith.constant 0 : i32
    %c0_i32_0 = arith.constant 0 : i32
    %c0_i32_1 = arith.constant 0 : i32
    return %c0_i32, %c0_i32_0 : i32, i32
  }
  func.func @transform_2(%arg0: i32) -> (i32, i32) {
    %c0_i32 = arith.constant 0 : i32
    %c0_i32_0 = arith.constant 0 : i32
    %c0_i32_1 = arith.constant 0 : i32
    return %c0_i32, %c0_i32_0 : i32, i32
  }
  func.func @transform_3(%arg0: i32) -> (i32, i32) {
    %c0_i32 = arith.constant 0 : i32
    %c0_i32_0 = arith.constant 0 : i32
    %c0_i32_1 = arith.constant 0 : i32
    return %c0_i32, %c0_i32_0 : i32, i32
  }
  func.func @transform_4(%arg0: i32) -> (i32, i32) {
    %c0_i32 = arith.constant 0 : i32
    %c0_i32_0 = arith.constant 0 : i32
    %c0_i32_1 = arith.constant 0 : i32
    return %c0_i32, %c0_i32_0 : i32, i32
  }
  func.func @transform_5(%arg0: i32) -> (i32, i32) {
    %c0_i32 = arith.constant 0 : i32
    %c0_i32_0 = arith.constant 0 : i32
    return %arg0, %c0_i32 : i32, i32
  }
}

</mosaic_0001>

<bundles_post_ra>
// kernel: tpu_custom_call.1
= control target key start
LH: loop header
LB: loop body
LE: loop exit
PB: predicated region body
PF: predicated region fallthrough
CT: control target
= control target key end

     0   :  { %10 = vsyncpa [#allocation3], 0  ;;  %s829_s0 = inlined_call_operand.vmem [shape: f32[16,128], index: 0, kind: input, shape index: {}]   ;;  %s830_s1 = inlined_call_operand.vmem [shape: f32[128,8], index: 1, kind: input, shape index: {}]   ;;  %s831_s2 = inlined_call_operand.vmem [shape: f32[1,8], index: 2, kind: input, shape index: {}]   ;;  %s832_s3 = inlined_call_operand.vmem [shape: f32[8,128], index: 3, kind: input, shape index: {}]   ;;  %s833_s4 = inlined_call_operand.vmem [shape: f32[1,128], index: 4, kind: input, shape index: {}]   ;;  %s834_s5 = inlined_call_operand.hbm [shape: f32[16,128], index: 5, kind: output, shape index: {}]  }
   0x1   :  { %12 = vsyncpa [#allocation3 + $0x1], 0  ;;  %s679_s18 = smov 0   ;;  %s681_s19 = smov 0  }
   0x2   :  { %s683_s20 = smov 0   ;;  %s685_s21 = smov 0  }
   0x3 LB: > { %s700_s22 = sadd.s32 4294967295, %s644_s21   ;;  %s471_s23 = sadd.s32 4294967294, %s644_s21   ;;  %s644_s21 = sphi %s685_s21, %s840_s21   ;;  %s640_s20 = sphi %s683_s20, %s839_s20   ;;  %s636_s19 = sphi %s681_s19, %s838_s19   ;;  %s632_s18 = sphi %s679_s18, %s837_s18  }
   0x4   : > { %s704_s24 = sadd.s32 1, %s644_s21   ;;  %s135_s25 = sadd.s32 1, %s640_s20 }
   0x5   : > { %s132_s26 = ssub.s32 %s644_s21, %s704_s24  ;;  %p145_p0 = scmp.ne.s32.totalorder %s640_s20, %s636_s19 }
   0x6   : > { %p133_p1 = scmp.eq.s32.totalorder %s132_s26, 0  ;;  %p146_p2 = scmp.eq.s32.totalorder %s700_s22, 1 }
   0x7   : > { %p151_p3 = scmp.ne.s32.totalorder %s636_s19, %s632_s18  ;;  %p152_p4 = scmp.eq.s32.totalorder %s471_s23, 1 }
   0x8   : > { %s715_s27 = scalar_select %p133_p1, %s640_s20, %s135_s25  }
   0x9   : > { %p717_p5 = por %p146_p2, %p145_p0  ;;  %p721_p6 = por %p152_p4, %p151_p3 }
   0xa   : > { %p474_p7 = scmp.ge.s32.totalorder %s644_s21, 1  ;;  %p189_p8 = scmp.lt.s32.totalorder %s644_s21, 3 }
   0xc   : > { %p190_p9 = pnand %p474_p7, %p189_p8 }
   0xd   : > { %p216_p10 = scmp.lt.s32.totalorder (!%p190_p9), %s700_s22, 1  ;;  %s213_s14 = sand.u32 (!%p190_p9), 1, %s636_s19  }
   0xe   : > { %193 = sbr.rel (%p190_p9) target bundleno = 457 (0x1c9), region = 40  ;;  %s475_s15 = sshll.u32 (!%p190_p9), %s213_s14, 3 }
   0xf   : > { %s481_s23 = sshll.u32 (!%p190_p9), %s700_s22, 7  ;;  %s215_s25 = scalar_lea.vmem (!%p190_p9), [#allocation2], %s475_s15 }
  0x10   : > { %s412_s26 = sshll.u32 (!%p190_p9), %s215_s25, 4  ;;  %s399_s8 = scalar_lea.sflag (!%p190_p9), [#allocation3], %s213_s14  ;;  %s413_s26 = int_to_ptr.vmem [resolvable:$true] %s412_s26 }
  0x11   : > { %s584_s9 = scalar_lea.vmem (!%p190_p9), %s413_s26, 128  ;;  %s648_s10 = smov (!%p190_p9), [#allocation2]  }
  0x12   : > { %p585_p11 = scmp.ne.s32.totalorder (!%p190_p9), %s413_s26, %s584_s9 }
  0x13   : > { %v236_v0 = vld [vmem:[%s830_s1 + $0x78] sm:$0xff]  ;;  %v646_v1 = vmov 0.0   ;;  %v235_v2 = vld [vmem:[%s830_s1 + $0x70] sm:$0xff]  ;;  %vm647_vm0 = vmmov 0   ;;  %v234_v3 = vld [vmem:[%s830_s1 + $0x68] sm:$0xff]  ;;  %s217_s11 = scalar_select %p216_p10, %s700_s22, 1 }
  0x14   : > { %503 = vmatprep.subr.mxu0 %v646_v1  ;;  %535 = vmatprep.mubr.msk.f32.mxu0 %vm647_vm0, %v646_v1  ;;  %v233_v4 = vld [vmem:[%s830_s1 + $0x60] sm:$0xff]  ;;  %v232_v5 = vld [vmem:[%s830_s1 + $0x58] sm:$0xff]  ;;  %v231_v6 = vld [vmem:[%s830_s1 + $0x50] sm:$0xff]  ;;  %vm323_vm1 = vcmask 64512   ;;  %p586_p12 = pnand %p585_p11, %p717_p5  ;;  %s588_s22 = sshll.u32 %s648_s10, 4  ;;  %s589_s22 = int_to_ptr.vmem [resolvable:$false] %s588_s22 }
  0x15   : > { %504 = vmatpush3.msra.mxu0 %v236_v0  ;;  %538 = vmatprep.subr.mxu1 %v646_v1  ;;  %v230_v7 = vld [vmem:[%s830_s1 + $0x48] sm:$0xff]  ;;  %v229_v8 = vld [vmem:[%s830_s1 + $0x40] sm:$0xff]  ;;  %v228_v9 = vld [vmem:[%s830_s1 + $0x38] sm:$0xff]  ;;  %s476_s16 = sshll.u32 %s217_s11, 3  ;;  %s590_s11 = scalar_lea.vmem %s589_s22, 256 }
  0x16   : > { %505 = vmatprep.subr.mxu0 %v646_v1  ;;  %540 = vmatprep.mubr.msk.f32.mxu1 %vm647_vm0, %v646_v1  ;;  %v227_v10 = vld [vmem:[%s830_s1 + $0x30] sm:$0xff]  ;;  %v226_v11 = vld [vmem:[%s830_s1 + $0x28] sm:$0xff]  ;;  %v225_v12 = vld [vmem:[%s830_s1 + $0x20] sm:$0xff]  ;;  %s219_s7 = scalar_lea.vmem %s829_s0, %s476_s16  ;;  %p587_p13 = pneg %p586_p12 }
  0x17   : > { %506 = vmatpush3.msra.mxu0 %v235_v2  ;;  %v224_v13 = vld [vmem:[%s830_s1 + $0x18] sm:$0xff]  ;;  %v223_v14 = vld [vmem:[%s830_s1 + $0x10] sm:$0xff]  ;;  %v222_v15 = vld [vmem:[%s830_s1 + $0x8] sm:$0xff]  ;;  %p591_p0 = scmp.lt.s32.totalorder %s413_s26, %s589_s22  ;;  %p592_p1 = scmp.lt.s32.totalorder %s590_s11, %s584_s9 }
  0x18   : > { %507 = vmatprep.subr.mxu0 %v646_v1  ;;  %v221_v16 = vld [vmem:[%s830_s1] sm:$0xff] }
  0x19   : > { %508 = vmatpush3.msra.mxu0 %v234_v3  ;;  %v220_v17 = vld [vmem:[%s219_s7] sm:$0xff]  ;;  %s794_s7 = scalar_lea.hbm %s834_s5, %s481_s23  ;;  %p593_p2 = por %p592_p1, %p591_p0 }
  0x1a   : > { %509 = vmatprep.subr.mxu0 %v646_v1  ;;  %v315_v18 = vld [vmem:[%s832_s3] sm:$0xff] }
  0x1b   : > { %510 = vmatpush3.msra.mxu0 %v233_v4  ;;  %539 = vmatpush3.msra.mxu1 %v315_v18  ;;  %v477_v19 = vld [vmem:[%s831_s2] ss:$0 sm:$0xff]  ;;  %p594_p3 = pnand %p593_p2, %p587_p13 }
  0x1c   : > { %511 = vmatprep.subr.mxu0 %v646_v1  ;;  %v478_v24 = vld [vmem:[%s833_s4] ss:$0 sm:$0xff] }
  0x1d   : > { %512 = vmatpush3.msra.mxu0 %v232_v5 }
  0x1e   : > { %513 = vmatprep.subr.mxu0 %v646_v1 }
  0x1f   : > { %514 = vmatpush3.msra.mxu0 %v231_v6 }
  0x20   : > { %515 = vmatprep.subr.mxu0 %v646_v1 }
  0x21   : > { %516 = vmatpush3.msra.mxu0 %v230_v7 }
  0x22   : > { %517 = vmatprep.subr.mxu0 %v646_v1 }
  0x23   : > { %518 = vmatpush3.msra.mxu0 %v229_v8 }
  0x24   : > { %519 = vmatprep.subr.mxu0 %v646_v1 }
  0x25   : > { %520 = vmatpush3.msra.mxu0 %v228_v9 }
  0x26   : > { %521 = vmatprep.subr.mxu0 %v646_v1 }
  0x27   : > { %522 = vmatpush3.msra.mxu0 %v227_v10 }
  0x28   : > { %523 = vmatprep.subr.mxu0 %v646_v1 }
  0x29   : > { %524 = vmatpush3.msra.mxu0 %v226_v11 }
  0x2a   : > { %525 = vmatprep.subr.mxu0 %v646_v1 }
  0x2b   : > { %526 = vmatpush3.msra.mxu0 %v225_v12 }
  0x2c   : > { %527 = vmatprep.subr.mxu0 %v646_v1 }
  0x2d   : > { %528 = vmatpush3.msra.mxu0 %v224_v13 }
  0x2e   : > { %529 = vmatprep.subr.mxu0 %v646_v1 }
  0x2f   : > { %530 = vmatpush3.msra.mxu0 %v223_v14 }
  0x30   : > { %531 = vmatprep.subr.mxu0 %v646_v1 }
  0x31   : > { %532 = vmatpush3.msra.mxu0 %v222_v15 }
  0x32   : > { %533 = vmatprep.subr.mxu0 %v646_v1 }
  0x33   : > { %534 = vmatpush3.msra.mxu0 %v221_v16 }
  0x34   : > { %536 = vmatmul.mubr.f32.vlgmr.msra.gmra.mxu0 %v220_v17 }
  0xf4   : > { %v310_v20 = vpop.f32.mrf.mxu0 }
  0xf5   : > { %v311_v21 = vadd.f32 %v477_v19, %v310_v20 }
  0xf6   : > { %v537_v22 = vpop.f32.mrf.mxu0 }
  0xf7   : > { %v314_v23 = vmax.f32 %v311_v21, 0.0 }
  0xf9   : > { %541 = vmatmul.mubr.msk.f32.vlgmr.msra.gmra.mxu1 %vm323_vm1, %v314_v23 }
 0x1b9   : > { %v393_v25 = vpop.f32.mrf.mxu1 }
 0x1ba   : > { %v394_v26 = vadd.f32 %v478_v24, %v393_v25 }
 0x1bb   : > { %v542_v27 = vpop.f32.mrf.mxu1 }
 0x1bc   : > { %397 = vst [vmem:[%s215_s25] sm:$0xff] %v394_v26 }
 0x1bd   : > { %597 = shalt.err (!%p594_p3)
}
 0x1be   : > { %s598_s12 = scalar_lea.hbm %s794_s7, 128  ;;  %s602_s15 = scalar_lea.hbm %s834_s5, 256 }
 0x1bf   : > { %p599_p4 = scmp.ne.s32.totalorder %s794_s7, %s598_s12  ;;  %p603_p9 = scmp.lt.s32.totalorder %s794_s7, %s834_s5 }
 0x1c0   : > { %p604_p10 = scmp.lt.s32.totalorder %s602_s15, %s598_s12 }
 0x1c1   : > { %p600_p7 = pnand %p599_p4, %p717_p5 }
 0x1c2   : > { %p605_p11 = por %p604_p10, %p603_p9 }
 0x1c3   : > { %p601_p8 = pneg %p600_p7 }
 0x1c5   : > { %p606_p12 = pnand %p605_p11, %p601_p8 }
 0x1c7   : > { %609 = shalt.err (!%p606_p12)
}
 0x1c8   : > { %543 = dma.vmem_to_hbm [thread:$0]  (%p717_p5), %s413_s26, 128, %s794_s7, %s399_s8  }
 0x1c9 PF: > { %p549_p13 = scmp.ge.s32.totalorder %s644_s21, 2  ;;  %s424_s23 = sand.u32 1, %s632_s18  }
 0x1ca   : > { %s425_s25 = scalar_lea.sflag [#allocation3], %s424_s23 }
 0x1cb   : > { %p546_p0 = pnand %p549_p13, %p721_p6 }
 0x1cd   : > { %p547_p1 = pneg %p546_p0 }
 0x1cf   : > { %627 = dma.done.wait (%p547_p1), %s425_s25, 128  }
 0x1d0   : > { %629 = vsyncadd (%p547_p1), %s425_s25, 4294967168  ;;  %p15_p2 = scmp.ge.s32.totalorder %s704_s24, 4   ;;  %s837_s18 = smov %s636_s19 }
 0x1d1   : > { %s838_s19 = smov %s640_s20  ;;  %s839_s20 = smov %s715_s27 }
 0x1d2   : > { %s840_s21 = smov %s704_s24  ;;  %17 = sbr.rel (!%p15_p2) target bundleno = 3 (0x3), region = 75 }
 0x1d7   :  { %430 = vsyncpa [#allocation3], 1 }
 0x1d8   :  { %432 = vsyncpa [#allocation3 + $0x1], 1 }

</bundles_post_ra>
